<compile_context>
chip_gen: v7x
topology: tpu7x:2x2x1
jax: 0.10.0
libtpu: 0.0.40
codegen_flags: <defaults>
</compile_context>

<pallas_src>
import functools

import jax
import jax.numpy as jnp
from jax import lax
from jax.experimental import pallas as pl
from jax.experimental.pallas import tpu as pltpu

EPS = 1e-7
_LANES = 128
_MAX_ROW_TILE = 512     # 512-row tiles already reach ~85% of HBM roofline
_F32_TEMPS = 6          # o, t, e, e+eps*s, log_term, per_loss live as f32 tiles


def _round_up(x, m):
    return ((x + m - 1) // m) * m


def _vmem_limit_bytes():
    """Scoped-VMEM request scaled from the chip's physical VMEM (v7x-safe)."""
    try:
        cap = int(pltpu.get_tpu_info().vmem_capacity_bytes)
    except Exception:
        cap = 64 * 1024 * 1024  # v7x per-TC physical VMEM (most restrictive)
    return min(40 * 1024 * 1024, cap // 2)


def _pick_row_tile(n, c, in_itemsize, vmem_limit):
    """Largest row tile (multiple of 8, <=512) whose working set fits VMEM.

    Charges both the double-buffered DMA streams (2 inputs x 2 buffers at the
    input dtype) and the ~_F32_TEMPS live f32 temporaries of the kernel body.
    """
    per_row_bytes = (2 * 2 * in_itemsize + _F32_TEMPS * 4) * c
    budget = (vmem_limit * 3) // 4  # keep scoped-VMEM headroom
    if per_row_bytes * 8 > budget:
        # TODO(synk): online-softmax C-tiled variant for very large class counts.
        raise ValueError(
            f"class dim C={c} too large for a single-pass row tile "
            f"(needs {per_row_bytes * 8} bytes, budget {budget})")
    t = budget // per_row_bytes
    t = max(8, min(_MAX_ROW_TILE, t))
    t = (t // 8) * 8
    t = min(t, _round_up(n, 8))  # don't allocate tiles larger than the padded batch
    return max(t, 8)


def _per_loss(o_ref, t_ref):
    """per_loss = -t * log(softmax(o) + EPS), divide-free."""
    o = o_ref[...].astype(jnp.float32)
    t = t_ref[...].astype(jnp.float32)
    m = jnp.max(o, axis=-1, keepdims=True)
    e = jnp.exp(o - m)
    s = jnp.sum(e, axis=-1, keepdims=True)
    # log(e/s + EPS) == log(e + EPS*s) - log(s): removes the exact divide and
    # the per-element multiply; adds one FMA/elem + one per-row log.
    log_term = jnp.log(e + EPS * s) - jnp.log(s)
    return -t * log_term


def _row_mask(row_tile, n_total):
    i = pl.program_id(0)
    row_ids = i * row_tile + lax.broadcasted_iota(jnp.int32, (row_tile, 1), 0)
    return row_ids < n_total


def _partial_kernel_max(o_ref, t_ref, out_ref, *, n_total, row_tile, ragged):
    per_loss = _per_loss(o_ref, t_ref)
    row_loss = jnp.max(per_loss, axis=-1, keepdims=True)       # (row_tile, 1)
    if ragged:
        # Compiled in only when N % row_tile != 0. Discards NaN/Inf garbage
        # from out-of-bounds rows of the last partial tile; one select per
        # row, not per element.
        row_loss = jnp.where(_row_mask(row_tile, n_total), row_loss, 0.0)
    partial = jnp.sum(row_loss)
    # Lane-dense write of this tile's partial sum; reduced in the wrapper.
    out_ref[...] = jnp.broadcast_to(partial, out_ref.shape).astype(jnp.float32)


def _partial_kernel_weight(o_ref, t_ref, w_ref, out_ref, *, n_total, row_tile, ragged):
    per_loss = _per_loss(o_ref, t_ref)
    if ragged:
        per_loss = jnp.where(_row_mask(row_tile, n_total), per_loss, 0.0)
    # sum_n sum_c per_loss[n,c] * w[c] == sum_c w[c] * sum_n per_loss[n,c]:
    # reduce rows first, then one (1, C) multiply + lane reduce (no per-row
    # broadcast-multiply, no per-row lane reduce, no MXU matvec).
    col_sum = jnp.sum(per_loss, axis=0, keepdims=True)          # (1, C)
    partial = jnp.sum(col_sum * w_ref[...].astype(jnp.float32))
    out_ref[...] = jnp.broadcast_to(partial, out_ref.shape).astype(jnp.float32)


def label_smooth_loss(outputs, targets, weight=None, *, row_tile=None):
    """Pallas implementation of LabelSmoothLoss.forward. Returns a scalar f32.

    bf16 inputs are the intended fast path on v5e/v6e (kernel upcasts in-VMEM).
    """
    N, C = outputs.shape
    assert targets.shape == (N, C)

    in_itemsize = max(jnp.dtype(outputs.dtype).itemsize,
                      jnp.dtype(targets.dtype).itemsize)
    vmem_limit = _vmem_limit_bytes()
    if row_tile is None:
        row_tile = _pick_row_tile(N, C, in_itemsize, vmem_limit)
    assert row_tile % 8 == 0
    num_tiles = pl.cdiv(N, row_tile)
    ragged = (N % row_tile) != 0

    if weight is None:
        kernel = functools.partial(
            _partial_kernel_max, n_total=N, row_tile=row_tile, ragged=ragged)
        in_specs = [
            pl.BlockSpec((row_tile, C), lambda i: (i, 0)),
            pl.BlockSpec((row_tile, C), lambda i: (i, 0)),
        ]
        args = (outputs, targets)
    else:
        # Lane-dense (1, C) layout instead of the lane-sparse (C, 1) matvec operand.
        w2d = weight.reshape(1, C)
        kernel = functools.partial(
            _partial_kernel_weight, n_total=N, row_tile=row_tile, ragged=ragged)
        in_specs = [
            pl.BlockSpec((row_tile, C), lambda i: (i, 0)),
            pl.BlockSpec((row_tile, C), lambda i: (i, 0)),
            pl.BlockSpec((1, C), lambda i: (0, 0)),
        ]
        args = (outputs, targets, w2d)

    partials = pl.pallas_call(
        kernel,
        out_shape=jax.ShapeDtypeStruct((num_tiles, _LANES), jnp.float32),
        grid=(num_tiles,),
        in_specs=in_specs,
        out_specs=pl.BlockSpec((1, _LANES), lambda i: (i, 0)),
        compiler_params=pltpu.CompilerParams(
            dimension_semantics=("parallel",),
            vmem_limit_bytes=vmem_limit,
        ),
    )(*args)
    # Tiny epilogue: per-tile partial sums -> mean. Independent of grid order,
    # so the row-tile axis can be sharded across v7x's two TensorCores.
    return jnp.sum(partials[:, 0]) / jnp.float32(N)


def _reference(outputs, targets, weight=None):
    o = outputs.astype(jnp.float32)
    t = targets.astype(jnp.float32)
    p = jax.nn.softmax(o, axis=-1)
    per_loss = -t * jnp.log(p + EPS)
    if weight is None:
        loss = jnp.max(per_loss, axis=-1)
    else:
        loss = per_loss @ weight.astype(jnp.float32).reshape(-1, 1)
    return jnp.mean(loss)


if __name__ == "__main__":
    N, C = 16, 32  # small: 16 samples, 32 classes
    key = jax.random.PRNGKey(0)
    k_o, k_t, k_o2, k_t2 = jax.random.split(key, 4)

    outputs = jax.random.normal(k_o, (N, C), dtype=jnp.float32)
    # targets: smoothed one-hot-like distributions (rows sum to 1)
    targets = jax.nn.softmax(jax.random.normal(k_t, (N, C), dtype=jnp.float32), axis=-1)
    # deterministic optional class weight (weight arg of __init__, shape [C])
    weight = jnp.linspace(0.5, 1.5, C, dtype=jnp.float32)

    # Path 1: weight=None (row-wise max of per_loss)
    loss_max = jax.block_until_ready(label_smooth_loss(outputs, targets, None))
    ref_max = _reference(outputs, targets, None)
    assert jnp.allclose(loss_max, ref_max, rtol=1e-5, atol=1e-5), (loss_max, ref_max)

    # Path 2: with class weight (per_loss @ weight), column-sum + lane reduce
    loss_w = jax.block_until_ready(label_smooth_loss(outputs, targets, weight))
    ref_w = _reference(outputs, targets, weight)
    assert jnp.allclose(loss_w, ref_w, rtol=1e-5, atol=1e-5), (loss_w, ref_w)

    # Path 3: ragged batch (N not a multiple of the row tile) exercises masking
    N2 = 13
    o2, t2 = outputs[:N2], targets[:N2]
    loss_r = jax.block_until_ready(label_smooth_loss(o2, t2, weight))
    ref_r = _reference(o2, t2, weight)
    assert jnp.allclose(loss_r, ref_r, rtol=1e-5, atol=1e-5), (loss_r, ref_r)

    # Path 4: bf16 inputs (halved HBM traffic; kernel upcasts internally)
    o_bf = outputs.astype(jnp.bfloat16)
    t_bf = targets.astype(jnp.bfloat16)
    loss_bf = jax.block_until_ready(label_smooth_loss(o_bf, t_bf, weight))
    ref_bf = _reference(o_bf, t_bf, weight)
    assert jnp.allclose(loss_bf, ref_bf, rtol=1e-5, atol=1e-5), (loss_bf, ref_bf)

    # Path 5: multi-tile parallel grid (4 tiles, last ragged) for both paths
    N3 = 200
    o3 = jax.random.normal(k_o2, (N3, C), dtype=jnp.float32)
    t3 = jax.nn.softmax(jax.random.normal(k_t2, (N3, C), dtype=jnp.float32), axis=-1)
    loss_m1 = jax.block_until_ready(label_smooth_loss(o3, t3, None, row_tile=64))
    loss_m2 = jax.block_until_ready(label_smooth_loss(o3, t3, weight, row_tile=64))
    assert jnp.allclose(loss_m1, _reference(o3, t3, None), rtol=1e-5, atol=1e-5)
    assert jnp.allclose(loss_m2, _reference(o3, t3, weight), rtol=1e-5, atol=1e-5)

    print("KERNEL_OK")
</pallas_src>

<mosaic_0001>
module attributes {stable_mosaic.version = 11 : i64} {
  func.func @_partial_kernel_max(%arg0: i32, %arg1: memref<16x32xf32, #tpu.memory_space<vmem>>, %arg2: memref<16x32xf32, #tpu.memory_space<vmem>>, %arg3: memref<1x128xf32, #tpu.memory_space<vmem>>) attributes {dimension_semantics = [#tpu.dimension_semantics<parallel>], iteration_bounds = array<i64: 1>, scalar_prefetch = 0 : i64, scratch_operands = 0 : i64, tpu.core_type = #tpu.core_type<tc>, window_params = [{transform_indices = @transform_0, window_bounds = array<i64: 16, 32>}, {transform_indices = @transform_1, window_bounds = array<i64: 16, 32>}, {transform_indices = @transform_2, window_bounds = array<i64: 1, 128>}]} {
    %c0 = arith.constant 0 : index
    %c0_0 = arith.constant 0 : index
    %0 = vector.load %arg1[%c0, %c0_0] : memref<16x32xf32, #tpu.memory_space<vmem>>, vector<16x32xf32>
    %c0_1 = arith.constant 0 : index
    %c0_2 = arith.constant 0 : index
    %1 = vector.load %arg2[%c0_1, %c0_2] : memref<16x32xf32, #tpu.memory_space<vmem>>, vector<16x32xf32>
    %cst = arith.constant dense<0xFF800000> : vector<16xf32>
    %2 = vector.multi_reduction <maximumf>, %0, %cst [1] : vector<16x32xf32> to vector<16xf32>
    %3 = vector.shape_cast %2 : vector<16xf32> to vector<16x1xf32>
    %4 = vector.broadcast %3 : vector<16x1xf32> to vector<16x32xf32>
    %5 = arith.subf %0, %4 : vector<16x32xf32>
    %6 = math.exp %5 : vector<16x32xf32>
    %cst_3 = arith.constant dense<0.000000e+00> : vector<16xf32>
    %7 = vector.multi_reduction <add>, %6, %cst_3 [1] : vector<16x32xf32> to vector<16xf32>
    %8 = vector.shape_cast %7 : vector<16xf32> to vector<16x1xf32>
    %cst_4 = arith.constant 1.000000e-07 : f32
    %9 = vector.broadcast %cst_4 : f32 to vector<16x1xf32>
    %10 = arith.mulf %9, %8 : vector<16x1xf32>
    %11 = vector.broadcast %10 : vector<16x1xf32> to vector<16x32xf32>
    %12 = arith.addf %6, %11 : vector<16x32xf32>
    %13 = math.log %12 : vector<16x32xf32>
    %14 = math.log %8 : vector<16x1xf32>
    %15 = vector.broadcast %14 : vector<16x1xf32> to vector<16x32xf32>
    %16 = arith.subf %13, %15 : vector<16x32xf32>
    %cst_5 = arith.constant 0.000000e+00 : f32
    %17 = vector.broadcast %cst_5 : f32 to vector<16x32xf32>
    %18 = arith.subf %17, %1 : vector<16x32xf32>
    %19 = arith.mulf %18, %16 : vector<16x32xf32>
    %cst_6 = arith.constant dense<0xFF800000> : vector<16xf32>
    %20 = vector.multi_reduction <maximumf>, %19, %cst_6 [1] : vector<16x32xf32> to vector<16xf32>
    %21 = vector.shape_cast %20 : vector<16xf32> to vector<16x1xf32>
    %22 = vector.shape_cast %21 : vector<16x1xf32> to vector<1x16x1xf32>
    %cst_7 = arith.constant dense<0.000000e+00> : vector<1xf32>
    %23 = vector.multi_reduction <add>, %22, %cst_7 [1, 2] : vector<1x16x1xf32> to vector<1xf32>
    %24 = vector.shape_cast %23 : vector<1xf32> to vector<1x1x1xf32>
    %25 = vector.extract %24[0, 0, 0] : f32 from vector<1x1x1xf32>
    %26 = vector.broadcast %25 : f32 to vector<1x128xf32>
    %c0_8 = arith.constant 0 : index
    %c0_9 = arith.constant 0 : index
    %27 = vector.load %arg3[%c0_8, %c0_9] : memref<1x128xf32, #tpu.memory_space<vmem>>, vector<1x128xf32>
    tpu.vector_store %arg3[%c0_8, %c0_9], %26 {strides = array<i32>} : memref<1x128xf32, #tpu.memory_space<vmem>>, vector<1x128xf32>,
    return
  }
  func.func @transform_0(%arg0: i32) -> (i32, i32) {
    %c0_i32 = arith.constant 0 : i32
    %c0_i32_0 = arith.constant 0 : i32
    return %arg0, %c0_i32 : i32, i32
  }
  func.func @transform_1(%arg0: i32) -> (i32, i32) {
    %c0_i32 = arith.constant 0 : i32
    %c0_i32_0 = arith.constant 0 : i32
    return %arg0, %c0_i32 : i32, i32
  }
  func.func @transform_2(%arg0: i32) -> (i32, i32) {
    %c0_i32 = arith.constant 0 : i32
    %c0_i32_0 = arith.constant 0 : i32
    return %arg0, %c0_i32 : i32, i32
  }
}

</mosaic_0001>

<bundles_post_ra>
// kernel: tpu_custom_call.1
= control target key start
LH: loop header
LB: loop body
LE: loop exit
PB: predicated region body
PF: predicated region fallthrough
CT: control target
= control target key end

     0   :  { %7 = vsyncpa [#allocation3], 0  ;;  %s271_s0 = inlined_call_operand.hbm [shape: f32[16,32], index: 0, kind: input, shape index: {}]   ;;  %s272_s1 = inlined_call_operand.hbm [shape: f32[16,32], index: 1, kind: input, shape index: {}]   ;;  %s273_s2 = inlined_call_operand.hbm [shape: f32[1,128], index: 2, kind: output, shape index: {}]  }
   0x1   :  { %8 = vsyncpa [#allocation6], 0 }
   0x2   :  { %9 = vsyncpa [#allocation4], 0  ;;  %s209_s9 = smov [#allocation2]   ;;  %s137_s13 = scalar_lea.hbm %s271_s0, 256 }
   0x3   :  { %s15_s10 = sshll.u32 %s209_s9, 4  ;;  %p138_p0 = scmp.ne.s32.totalorder %s271_s0, %s137_s13  ;;  %s16_s10 = int_to_ptr.vmem [resolvable:$true] %s15_s10 }
   0x4   :  { %p141_p1 = scmp.lt.u32.totalorder %s137_s13, %s271_s0 }
   0x6   :  { %p143_p2 = pnand %p141_p1, %p138_p0 }
   0x8   :  { %146 = shalt.err (!%p143_p2)
}
   0x9   :  { %s147_s18 = scalar_lea.vmem %s16_s10, 256  ;;  %p152_p4 = scmp.lt.s32.totalorder %s16_s10, %s16_s10 }
   0xa   :  { %p148_p3 = scmp.ne.s32.totalorder %s16_s10, %s147_s18  ;;  %p153_p5 = scmp.lt.s32.totalorder %s147_s18, %s147_s18 }
   0xc   :  { %p154_p6 = por %p153_p5, %p152_p4 }
   0xe   :  { %p155_p7 = pnand %p154_p6, %p148_p3 }
  0x10   :  { %158 = shalt.err (!%p155_p7)
}
  0x11   :  { %s210_s19 = smov 128   ;;  %s211_s20 = smov 8  }
  0x12   :  { %21 = dma.hbm_to_vmem [thread:$0]  %s271_s0, 256, %s16_s10, [#allocation3], %s210_s19, %s210_s19, %s211_s20  }
  0x13   :  { %s212_s23 = smov [#allocation5]   ;;  %s159_s27 = scalar_lea.hbm %s272_s1, 256 }
  0x14   :  { %s27_s24 = sshll.u32 %s212_s23, 4  ;;  %p160_p8 = scmp.ne.s32.totalorder %s272_s1, %s159_s27  ;;  %s28_s24 = int_to_ptr.vmem [resolvable:$true] %s27_s24 }
  0x15   :  { %p163_p9 = scmp.lt.u32.totalorder %s159_s27, %s272_s1 }
  0x17   :  { %p165_p10 = pnand %p163_p9, %p160_p8 }
  0x19   :  { %168 = shalt.err (!%p165_p10)
}
  0x1a   :  { %s169_s4 = scalar_lea.vmem %s28_s24, 256  ;;  %p174_p12 = scmp.lt.s32.totalorder %s28_s24, %s28_s24 }
  0x1b   :  { %p170_p11 = scmp.ne.s32.totalorder %s28_s24, %s169_s4  ;;  %p175_p13 = scmp.lt.s32.totalorder %s169_s4, %s169_s4 }
  0x1d   :  { %p176_p0 = por %p175_p13, %p174_p12 }
  0x1f   :  { %p177_p1 = pnand %p176_p0, %p170_p11 }
  0x21   :  { %180 = shalt.err (!%p177_p1)
}
  0x22   :  { %33 = dma.hbm_to_vmem [thread:$0]  %s272_s1, 256, %s28_s24, [#allocation6], %s210_s19, %s210_s19, %s211_s20  }
  0x23   :  { %203 = dma.done.wait [#allocation3], 256  }
  0x24   :  { %204 = vsyncadd [#allocation3], 4294967040 }
  0x25   :  { %205 = dma.done.wait [#allocation6], 256  }
  0x26   :  { %206 = vsyncadd [#allocation6], 4294967040  ;;  %vm44_vm0 = vcmask 261120   ;;  %v40_v0 = vld [vmem:[#allocation2] sm:$0xff]  ;;  %v41_v1 = vld [vmem:[#allocation2 + $0x8] sm:$0xff]  ;;  %vm87_vm1 = vcmask 7168  }
  0x27   :  { %v45_v2 = vsel %vm44_vm0, %v40_v0, -inf  ;;  %v48_v3 = vsel %vm44_vm0, %v41_v1, -inf  ;;  %v42_v21 = vld [vmem:[#allocation5] sm:$0xff]  ;;  %v43_v27 = vld [vmem:[#allocation5 + $0x8] sm:$0xff]  ;;  %s213_s1 = smov [#allocation7]  }
  0x28   :  { %46 = vmax.xlane.f32.xlu0 %v45_v2  ;;  %v77_v25 = vsub.f32 0.0, %v42_v21  ;;  %v78_v33 = vsub.f32 0.0, %v43_v27  ;;  %s108_s6 = sshll.u32 %s213_s1, 4  ;;  %s109_s6 = int_to_ptr.vmem [resolvable:$true] %s108_s6 }
  0x29   :  { %s181_s8 = scalar_lea.vmem %s109_s6, 16  ;;  %s185_s9 = scalar_lea.vmem %s109_s6, 32 }
  0x2a   :  { %p182_p2 = scmp.ne.s32.totalorder %s109_s6, %s181_s8  ;;  %p186_p3 = scmp.lt.s32.totalorder %s109_s6, %s109_s6 }
  0x2b   :  { %p187_p4 = scmp.lt.s32.totalorder %s185_s9, %s181_s8 }
  0x2c   :  { %49 = vmax.xlane.f32.xlu0 %v48_v3 }
  0x2d   :  { %p188_p5 = por %p187_p4, %p186_p3 }
  0x2f   :  { %p189_p6 = pnand %p188_p5, %p182_p2 }
  0xb5   :  { %v47_v4 = vpop.xlane.xlu0 %46 }
  0xb6   :  { %v51_v5 = vsub.f32 %v40_v0, %v47_v4 }
  0xb8   :  { %v53_v6 = vmul.f32 1.442695, %v51_v5 }
  0xb9   :  { %v50_v7 = vpop.xlane.xlu0 %49 }
  0xba   :  { %125 = vpow2.f32 %v53_v6  ;;  %v52_v8 = vsub.f32 %v41_v1, %v50_v7 }
  0xbc   :  { %v55_v9 = vmul.f32 1.442695, %v52_v8 }
  0xbe   :  { %127 = vpow2.f32 %v55_v9 }
  0xc4   :  { %v126_v10 = vpop.eup %125 }
  0xc5   :  { %v57_v11 = vsel %vm44_vm0, %v126_v10, 0.0 }
  0xc6   :  { %58 = vadd.xlane.f32.xlu1 %v57_v11 }
  0xc8   :  { %v128_v12 = vpop.eup %127 }
  0xc9   :  { %v60_v13 = vsel %vm44_vm0, %v128_v12, 0.0 }
  0xca   :  { %61 = vadd.xlane.f32.xlu1 %v60_v13 }
 0x153   :  { %v59_v14 = vpop.xlane.xlu1 %58 }
 0x154   :  { %v63_v15 = vmul.f32 1e-07, %v59_v14  ;;  %129 = vlog2.f32 %v59_v14 }
 0x156   :  { %v65_v16 = vadd.f32 %v126_v10, %v63_v15 }
 0x157   :  { %v62_v17 = vpop.xlane.xlu1 %61 }
 0x158   :  { %131 = vlog2.f32 %v65_v16  ;;  %v64_v18 = vmul.f32 1e-07, %v62_v17 }
 0x159   :  { %133 = vlog2.f32 %v62_v17 }
 0x15a   :  { %v66_v19 = vadd.f32 %v128_v12, %v64_v18 }
 0x15c   :  { %135 = vlog2.f32 %v66_v19 }
 0x15e   :  { %v130_v20 = vpop.eup %129 }
 0x15f   :  { %v72_v23 = vmul.f32 0.6931472, %v130_v20 }
 0x162   :  { %v132_v22 = vpop.eup %131 }
 0x163   :  { %v68_v24 = vmul.f32 0.6931472, %v132_v22  ;;  %v134_v26 = vpop.eup %133 }
 0x164   :  { %v74_v30 = vmul.f32 0.6931472, %v134_v26 }
 0x165   :  { %v75_v28 = vsub.f32 %v68_v24, %v72_v23 }
 0x166   :  { %v136_v29 = vpop.eup %135 }
 0x167   :  { %v79_v31 = vmul.f32 %v77_v25, %v75_v28  ;;  %v70_v32 = vmul.f32 0.6931472, %v136_v29 }
 0x169   :  { %v81_v34 = vsel %vm44_vm0, %v79_v31, -inf  ;;  %v76_v35 = vsub.f32 %v70_v32, %v74_v30 }
 0x16a   :  { %82 = vmax.xlane.f32.xlu0 %v81_v34 }
 0x16b   :  { %v80_v36 = vmul.f32 %v78_v33, %v76_v35 }
 0x16d   :  { %v84_v37 = vsel %vm44_vm0, %v80_v36, -inf }
 0x16e   :  { %85 = vmax.xlane.f32.xlu1 %v84_v37 }
 0x1f7   :  { %v83_v38 = vpop.xlane.xlu0 %82 }
 0x1f8   :  { %v88_v40 = vsel %vm87_vm1, %v83_v38, 0.0 }
 0x1fb   :  { %v86_v39 = vpop.xlane.xlu1 %85 }
 0x1fc   :  { %v89_v41 = vsel %vm87_vm1, %v86_v39, 0.0 }
 0x1fd   :  { %v90_v42 = vadd.f32 %v89_v41, %v88_v40 }
 0x1ff   :  { %91 = vadd.xlane.f32.xlu0 %v90_v42 }
 0x28c   :  { %v92_v43 = vpop.xlane.xlu0 %91 }
 0x28d   :  { %v93_v44 = vrot.slane %v92_v43, 4 }
 0x28f   :  { %v94_v45 = vadd.f32 %v93_v44, %v92_v43 }
 0x291   :  { %v95_v46 = vrot.slane %v94_v45, 2 }
 0x293   :  { %v96_v47 = vadd.f32 %v95_v46, %v94_v45 }
 0x295   :  { %v97_v48 = vrot.slane %v96_v47, 1 }
 0x297   :  { %v98_v49 = vadd.f32 %v97_v48, %v96_v47 }
 0x299   :  { %118 = vpush %v98_v49 }
 0x2ca   :  { %s119_s7 = spop %118 }
 0x2cb   :  { %v100_v50 = vstv %s119_s7 }
 0x2cc   :  { %101 = vst [vmem:[#allocation7] sm:$0x1] %v100_v50 }
 0x2cd   :  { %192 = shalt.err (!%p189_p6)
}
 0x2ce   :  { %s193_s12 = scalar_lea.hbm %s273_s2, 16 }
 0x2cf   :  { %p194_p7 = scmp.ne.s32.totalorder %s273_s2, %s193_s12  ;;  %p197_p8 = scmp.lt.u32.totalorder %s193_s12, %s273_s2 }
 0x2d1   :  { %p199_p9 = pnand %p197_p8, %p194_p7 }
 0x2d3   :  { %202 = shalt.err (!%p199_p9)
}
 0x2d4   :  { %111 = dma.vmem_to_hbm [thread:$0]  %s109_s6, 16, %s273_s2, [#allocation4]  }
 0x2d5   :  { %207 = dma.done.wait [#allocation4], 16  }
 0x2d6   :  { %208 = vsyncadd [#allocation4], 4294967280 }
 0x2d7   :  { %115 = vsyncpa [#allocation3], 1 }
 0x2d8   :  { %116 = vsyncpa [#allocation6], 1 }
 0x2d9   :  { %117 = vsyncpa [#allocation4], 1 }

</bundles_post_ra>
